<compile_context>
chip_gen: v5e
topology: v5e:2x2
jax: 0.10.0
libtpu: 0.0.40
codegen_flags: <defaults>
</compile_context>

<pallas_src>
import functools

import jax
import jax.numpy as jnp
from jax.experimental import pallas as pl
from jax.experimental.pallas import tpu as pltpu


# Batch-tile cap: keeps the double-buffered (TB, Hid, In) d_weights_0 blocks (in +
# aliased out) around 4-5 MiB of VMEM — comfortably inside v7x's 64 MiB as well.
_TB_MAX = 8


def _pick_tb(batch):
    """Largest divisor of `batch` that is <= _TB_MAX (so no tail block is needed)."""
    tb = 1
    for d in range(1, min(batch, _TB_MAX) + 1):
        if batch % d == 0:
            tb = d
    return tb


# ----------------------------------------------------------------------------
# Kernels
# ----------------------------------------------------------------------------
def _fwd_kernel(x_ref, w0_ref, b0_ref, w1_ref, b1_ref,
                dw0t_ref, db0_ref, dw1_ref, db1_ref,
                out_ref, s0_ref):
    """Forward only (update_target is None). One grid step = TB samples."""
    tb = x_ref.shape[0]

    # Shared layer-0 matmul for the whole tile: (TB, In) @ (In, Hid) on the MXU.
    s0_ref[...] = jnp.dot(x_ref[...], w0_ref[...], preferred_element_type=jnp.float32)

    b0 = b0_ref[...]            # (1, Hid)
    w1 = w1_ref[...]            # (Hid, Out)
    b1 = b1_ref[...]            # (1, Out)

    @pl.loop(0, tb)
    def _(b):
        xb = x_ref[pl.ds(b, 1), :]                                   # (1, In)
        # Per-sample dynamic layer-0 contribution: VPU multiply + lane reduce.
        # (d_weights_0 is stored transposed (Hid, In), lane-dense in In.)
        dcon0 = jnp.sum(dw0t_ref[b] * xb, axis=-1, keepdims=True).T  # (1, Hid)
        pre0 = s0_ref[pl.ds(b, 1), :] + dcon0 + b0 + db0_ref[pl.ds(b, 1), :]
        h = jnp.tanh(pre0)                                           # (1, Hid)

        w1_full = w1 + dw1_ref[b]                                    # (Hid, Out), tiny
        out2 = (jnp.dot(h, w1_full, preferred_element_type=jnp.float32)
                + b1 + db1_ref[pl.ds(b, 1), :])                      # (1, Out)

        # NOTE: the reference divides by the *squared* L2 norm (no sqrt) — keep it.
        l2 = jnp.sum(out2 * out2, axis=-1, keepdims=True)            # (1, 1)
        inv_l2 = pl.reciprocal(l2, approx=True)                      # EUP
        inv_l2 = inv_l2 * (2.0 - l2 * inv_l2)                        # one Newton step
        out_ref[pl.ds(b, 1), :] = out2 * inv_l2


def _fwd_grad_kernel(x_ref, t_ref, w0_ref, b0_ref, w1_ref, b1_ref,
                     dw0t_ref, db0_ref, dw1_ref, db1_ref,
                     out_ref, ndw0t_ref, ndb0_ref, ndw1_ref, ndb1_ref,
                     s0_ref, *, lr):
    """Forward + analytic self-gradients + fused SGD update of the d-params."""
    tb = x_ref.shape[0]

    s0_ref[...] = jnp.dot(x_ref[...], w0_ref[...], preferred_element_type=jnp.float32)

    b0 = b0_ref[...]            # (1, Hid)
    w1 = w1_ref[...]            # (Hid, Out)
    b1 = b1_ref[...]            # (1, Out)

    @pl.loop(0, tb)
    def _(b):
        xb = x_ref[pl.ds(b, 1), :]                                   # (1, In)
        dw0t_b = dw0t_ref[b]                                         # (Hid, In)

        # ---- forward -------------------------------------------------------
        dcon0 = jnp.sum(dw0t_b * xb, axis=-1, keepdims=True).T       # (1, Hid)
        pre0 = s0_ref[pl.ds(b, 1), :] + dcon0 + b0 + db0_ref[pl.ds(b, 1), :]
        h = jnp.tanh(pre0)                                           # (1, Hid)

        dw1_b = dw1_ref[b]                                           # (Hid, Out)
        w1_full = w1 + dw1_b
        out2 = (jnp.dot(h, w1_full, preferred_element_type=jnp.float32)
                + b1 + db1_ref[pl.ds(b, 1), :])                      # (1, Out)

        l2 = jnp.sum(out2 * out2, axis=-1, keepdims=True)            # (1, 1)
        inv_l2 = pl.reciprocal(l2, approx=True)
        inv_l2 = inv_l2 * (2.0 - l2 * inv_l2)
        out_ref[pl.ds(b, 1), :] = out2 * inv_l2

        # ---- self-gradients + fused "d -= lr * grad" update -----------------
        # t = F.normalize(update_target, dim=-1)   (torch default eps = 1e-12)
        t = t_ref[pl.ds(b, 1), :]                                    # (1, Out)
        t_norm = jnp.sqrt(jnp.sum(t * t, axis=-1, keepdims=True))
        tn = t / jnp.maximum(t_norm, 1e-12)

        # dL/d bias_1
        tdot = jnp.sum(tn * out2, axis=-1, keepdims=True)
        gb1 = (-tn + (2.0 * tdot * inv_l2) * out2) * inv_l2          # (1, Out)
        ndb1_ref[pl.ds(b, 1), :] = db1_ref[pl.ds(b, 1), :] - lr * gb1

        # dL/d weights_1 = outer(tanh_out, gb1) — VPU broadcast, fused update.
        ndw1_ref[b] = dw1_b - lr * (h.T * gb1)                       # (Hid, Out)

        # dL/d bias_0 : tanh backward through (weights_1 + d_weights_1)
        gb0 = (1.0 - h * h) * jnp.dot(gb1, w1_full.T,
                                      preferred_element_type=jnp.float32)  # (1, Hid)
        ndb0_ref[pl.ds(b, 1), :] = db0_ref[pl.ds(b, 1), :] - lr * gb0

        # dL/d weights_0 (transposed storage (Hid, In)): outer(gb0, x) as a
        # lane-dense VPU broadcast — no x.T transpose, no K=1 MXU — fused update.
        ndw0t_ref[b] = dw0t_b - lr * (gb0.T * xb)                    # (Hid, In)


# ----------------------------------------------------------------------------
# Pallas wrappers
# ----------------------------------------------------------------------------
def _param_in_specs(tb, In, Hid, Out):
    return [
        pl.BlockSpec((In, Hid), lambda g: (0, 0)),          # weights_0  (shared)
        pl.BlockSpec((1, Hid), lambda g: (0, 0)),           # bias_0     as (1, Hid)
        pl.BlockSpec((Hid, Out), lambda g: (0, 0)),         # weights_1  (shared)
        pl.BlockSpec((1, Out), lambda g: (0, 0)),           # bias_1     as (1, Out)
        pl.BlockSpec((tb, Hid, In), lambda g: (g, 0, 0)),   # d_weights_0 (transposed)
        pl.BlockSpec((tb, Hid), lambda g: (g, 0)),          # d_bias_0
        pl.BlockSpec((tb, Hid, Out), lambda g: (g, 0, 0)),  # d_weights_1
        pl.BlockSpec((tb, Out), lambda g: (g, 0)),          # d_bias_1
    ]


@jax.jit
def forward_no_target(x2d, w0, b0, w1, b1, dw0t, db0, dw1, db1):
    B, In = x2d.shape
    Hid = w0.shape[1]
    Out = w1.shape[1]
    tb = _pick_tb(B)
    b0r = b0.reshape(1, Hid)
    b1r = b1.reshape(1, Out)
    cost = pl.CostEstimate(
        flops=int(4 * B * In * Hid + 4 * B * Hid * Out),
        transcendentals=int(B * (Hid + 1)),
        bytes_accessed=int(4 * (B * Hid * In + 2 * B * In + In * Hid
                                + B * Hid * Out + Hid * Out + 4 * B * (Hid + Out))),
    )
    return pl.pallas_call(
        _fwd_kernel,
        out_shape=jax.ShapeDtypeStruct((B, Out), jnp.float32),
        grid_spec=pltpu.PrefetchScalarGridSpec(
            num_scalar_prefetch=0,
            grid=(B // tb,),
            in_specs=[pl.BlockSpec((tb, In), lambda g: (g, 0))]
                     + _param_in_specs(tb, In, Hid, Out),
            out_specs=pl.BlockSpec((tb, Out), lambda g: (g, 0)),
            scratch_shapes=[pltpu.VMEM((tb, Hid), jnp.float32)],
        ),
        compiler_params=pltpu.CompilerParams(dimension_semantics=("parallel",)),
        cost_estimate=cost,
    )(x2d, w0, b0r, w1, b1r, dw0t, db0, dw1, db1)


@functools.partial(jax.jit, static_argnames=("lr",), donate_argnums=(6, 7, 8, 9))
def forward_with_target(x2d, target, w0, b0, w1, b1, dw0t, db0, dw1, db1, *, lr):
    B, In = x2d.shape
    Hid = w0.shape[1]
    Out = w1.shape[1]
    tb = _pick_tb(B)
    b0r = b0.reshape(1, Hid)
    b1r = b1.reshape(1, Out)
    cost = pl.CostEstimate(
        flops=int(8 * B * In * Hid + 12 * B * Hid * Out),
        transcendentals=int(B * (Hid + 2)),
        bytes_accessed=int(4 * (2 * B * Hid * In + 2 * B * In + In * Hid
                                + 2 * B * Hid * Out + Hid * Out
                                + 8 * B * (Hid + Out))),
    )
    out_shapes = (
        jax.ShapeDtypeStruct((B, Out), jnp.float32),        # l2_normed_out2
        jax.ShapeDtypeStruct((B, Hid, In), jnp.float32),    # updated d_weights_0 (transposed)
        jax.ShapeDtypeStruct((B, Hid), jnp.float32),        # updated d_bias_0
        jax.ShapeDtypeStruct((B, Hid, Out), jnp.float32),   # updated d_weights_1
        jax.ShapeDtypeStruct((B, Out), jnp.float32),        # updated d_bias_1
    )
    out_specs = (
        pl.BlockSpec((tb, Out), lambda g: (g, 0)),
        pl.BlockSpec((tb, Hid, In), lambda g: (g, 0, 0)),
        pl.BlockSpec((tb, Hid), lambda g: (g, 0)),
        pl.BlockSpec((tb, Hid, Out), lambda g: (g, 0, 0)),
        pl.BlockSpec((tb, Out), lambda g: (g, 0)),
    )
    return pl.pallas_call(
        functools.partial(_fwd_grad_kernel, lr=float(lr)),
        out_shape=out_shapes,
        grid_spec=pltpu.PrefetchScalarGridSpec(
            num_scalar_prefetch=0,
            grid=(B // tb,),
            in_specs=[pl.BlockSpec((tb, In), lambda g: (g, 0)),
                      pl.BlockSpec((tb, Out), lambda g: (g, 0))]
                     + _param_in_specs(tb, In, Hid, Out),
            out_specs=out_specs,
            scratch_shapes=[pltpu.VMEM((tb, Hid), jnp.float32)],
        ),
        compiler_params=pltpu.CompilerParams(dimension_semantics=("parallel",)),
        # Fused SGD update: the d-params are read, updated in-kernel, and written
        # back to the *same* HBM buffers (no gradient round trip through HBM).
        input_output_aliases={6: 1, 7: 2, 8: 3, 9: 4},
        cost_estimate=cost,
    )(x2d, target, w0, b0r, w1, b1r, dw0t, db0, dw1, db1)


# ----------------------------------------------------------------------------
# Module-like wrapper (plain JAX glue)
# ----------------------------------------------------------------------------
class SelfGradDynamicMLP2L:
    """JAX/Pallas port of the PyTorch SelfGradDynamicMLP2L neck (tanh only).

    Internal note: d_weights_0 is stored transposed, shape (B, Hid, In), so the
    kernel sees a lane-dense last dimension; all math is equivalent.
    """

    def __init__(self, in_channels, hid_channels, out_channels,
                 learning_rate=0.001, key=None):
        self.in_channels = in_channels
        self.hid_channels = hid_channels
        self.out_channels = out_channels
        self.learning_rate = learning_rate
        key = jax.random.PRNGKey(0) if key is None else key
        k0, k1 = jax.random.split(key)
        # deterministic synthetic init (torch module zero-inits then init_weights('normal'))
        self.weights_0 = 0.01 * jax.random.normal(k0, (in_channels, hid_channels), jnp.float32)
        self.bias_0 = jnp.zeros((hid_channels,), jnp.float32)
        self.weights_1 = 0.01 * jax.random.normal(k1, (hid_channels, out_channels), jnp.float32)
        self.bias_1 = jnp.zeros((out_channels,), jnp.float32)
        self.d_weights_0 = None     # (B, Hid, In)  (transposed storage)
        self.d_bias_0 = None        # (B, Hid)
        self.d_weights_1 = None     # (B, Hid, Out)
        self.d_bias_1 = None        # (B, Out)

    def init_d_params(self, batch_size):
        self.d_weights_0 = jnp.zeros(
            (batch_size, self.hid_channels, self.in_channels), jnp.float32)
        self.d_bias_0 = jnp.zeros((batch_size, self.hid_channels), jnp.float32)
        self.d_weights_1 = jnp.zeros(
            (batch_size, self.hid_channels, self.out_channels), jnp.float32)
        self.d_bias_1 = jnp.zeros((batch_size, self.out_channels), jnp.float32)

    def forward(self, x, update_target=None):
        assert len(x) == 1
        x2d = x[0].reshape(x[0].shape[0], -1).astype(jnp.float32)   # x.view(B, -1)
        params = (self.weights_0, self.bias_0, self.weights_1, self.bias_1,
                  self.d_weights_0, self.d_bias_0, self.d_weights_1, self.d_bias_1)
        if update_target is None:
            out = forward_no_target(x2d, *params)
            return [out]
        out, ndw0t, ndb0, ndw1, ndb1 = forward_with_target(
            x2d, update_target.astype(jnp.float32), *params, lr=self.learning_rate)
        # the SGD-style update is fused into the kernel; just rebind the state
        self.d_weights_0 = ndw0t
        self.d_bias_0 = ndb0
        self.d_weights_1 = ndw1
        self.d_bias_1 = ndb1
        return [out]


# ----------------------------------------------------------------------------
# Pure-JAX reference (for numerical sanity checks; natural d_weights_0 layout)
# ----------------------------------------------------------------------------
def _ref_apply(x2d, w0, b0, w1, b1, dw0_nat, db0, dw1, db1):
    # Split form (x@w0 + x@dw0) is mathematically identical to x@(w0+dw0) and
    # mirrors the kernel's evaluation order.
    hi = jax.lax.Precision.HIGHEST
    pre0 = (jnp.dot(x2d, w0)
            + jnp.einsum('bi,bih->bh', x2d, dw0_nat, precision=hi)
            + b0[None, :] + db0)
    h = jnp.tanh(pre0)
    out2 = (jnp.einsum('bh,bho->bo', h, w1[None] + dw1)
            + b1[None, :] + db1)
    l2 = jnp.sum(out2 * out2, axis=-1, keepdims=True)
    return h, out2, l2


def _ref_forward(x2d, w0, b0, w1, b1, dw0_nat, db0, dw1, db1):
    _, out2, l2 = _ref_apply(x2d, w0, b0, w1, b1, dw0_nat, db0, dw1, db1)
    return out2 / l2


def _ref_forward_and_update(x2d, target, w0, b0, w1, b1, dw0_nat, db0, dw1, db1, lr):
    h, out2, l2 = _ref_apply(x2d, w0, b0, w1, b1, dw0_nat, db0, dw1, db1)
    out = out2 / l2
    tn = target / jnp.maximum(
        jnp.sqrt(jnp.sum(target * target, axis=-1, keepdims=True)), 1e-12)
    gb1 = -tn / l2 + jnp.sum(tn * out2, axis=-1, keepdims=True) / (l2 * l2) * 2.0 * out2
    gw1 = h[:, :, None] * gb1[:, None, :]                          # (B, Hid, Out)
    gb0 = (1.0 - h * h) * jnp.einsum('bo,bho->bh', gb1, w1[None] + dw1)
    gw0 = x2d[:, :, None] * gb0[:, None, :]                        # (B, In, Hid)
    return (out,
            dw0_nat - lr * gw0,
            db0 - lr * gb0,
            dw1 - lr * gw1,
            db1 - lr * gb1)


if __name__ == "__main__":
    key = jax.random.PRNGKey(0)
    kx, kt, kd0, kd1, kd2, kd3, kp = jax.random.split(key, 7)

    B, C, H, W = 2, 4, 16, 16
    in_channels = C * H * W          # 1024
    hid_channels = 32
    out_channels = 32

    x_nchw = jax.random.normal(kx, (B, C, H, W), jnp.float32)
    target = jax.random.normal(kt, (B, out_channels), jnp.float32)
    x2d = x_nchw.reshape(B, -1)

    neck = SelfGradDynamicMLP2L(in_channels, hid_channels, out_channels, key=kp)
    neck.init_d_params(B)
    # give the per-batch dynamic params nonzero values so the batched path is exercised
    dw0_nat = 0.001 * jax.random.normal(kd0, (B, in_channels, hid_channels), jnp.float32)
    neck.d_weights_0 = jnp.transpose(dw0_nat, (0, 2, 1))            # transposed storage
    neck.d_bias_0 = 0.001 * jax.random.normal(kd1, (B, hid_channels), jnp.float32)
    neck.d_weights_1 = 0.001 * jax.random.normal(kd2, (B, hid_channels, out_channels), jnp.float32)
    neck.d_bias_1 = 0.001 * jax.random.normal(kd3, (B, out_channels), jnp.float32)

    # 1) forward without update_target
    out = neck.forward([x_nchw])[0]
    jax.block_until_ready(out)
    ref_out = _ref_forward(x2d, neck.weights_0, neck.bias_0, neck.weights_1, neck.bias_1,
                           dw0_nat, neck.d_bias_0, neck.d_weights_1, neck.d_bias_1)
    assert jnp.allclose(out, ref_out, rtol=5e-3, atol=5e-3), "forward mismatch vs reference"

    # expected fused-update results (computed BEFORE the donating call below)
    (ref_out2, ref_ndw0, ref_ndb0, ref_ndw1, ref_ndb1) = _ref_forward_and_update(
        x2d, target, neck.weights_0, neck.bias_0, neck.weights_1, neck.bias_1,
        dw0_nat, neck.d_bias_0, neck.d_weights_1, neck.d_bias_1, neck.learning_rate)
    jax.block_until_ready(ref_ndw0)

    # 2) forward with update_target (also updates the d-params in place via aliasing)
    out2 = neck.forward([x_nchw], update_target=target)[0]
    jax.block_until_ready(out2)
    jax.block_until_ready(neck.d_weights_0)

    assert jnp.allclose(out2, ref_out2, rtol=5e-3, atol=5e-3), "grad-path output mismatch"
    assert jnp.allclose(neck.d_weights_0, jnp.transpose(ref_ndw0, (0, 2, 1)),
                        rtol=1e-2, atol=1e-4), "d_weights_0 update mismatch"
    assert jnp.allclose(neck.d_bias_0, ref_ndb0, rtol=1e-2, atol=1e-4), "d_bias_0 mismatch"
    assert jnp.allclose(neck.d_weights_1, ref_ndw1, rtol=1e-2, atol=1e-4), "d_weights_1 mismatch"
    assert jnp.allclose(neck.d_bias_1, ref_ndb1, rtol=1e-2, atol=1e-4), "d_bias_1 mismatch"

    print("KERNEL_OK")
</pallas_src>

<mosaic_0001>
module attributes {stable_mosaic.version = 11 : i64} {
  func.func @_fwd_kernel(%arg0: i32, %arg1: memref<2x1024xf32, #tpu.memory_space<vmem>>, %arg2: memref<1024x32xf32, #tpu.memory_space<vmem>>, %arg3: memref<1x32xf32, #tpu.memory_space<vmem>>, %arg4: memref<32x32xf32, #tpu.memory_space<vmem>>, %arg5: memref<1x32xf32, #tpu.memory_space<vmem>>, %arg6: memref<2x32x1024xf32, #tpu.memory_space<vmem>>, %arg7: memref<2x32xf32, #tpu.memory_space<vmem>>, %arg8: memref<2x32x32xf32, #tpu.memory_space<vmem>>, %arg9: memref<2x32xf32, #tpu.memory_space<vmem>>, %arg10: memref<2x32xf32, #tpu.memory_space<vmem>>, %arg11: memref<2x32xf32, #tpu.memory_space<vmem>>) attributes {dimension_semantics = [#tpu.dimension_semantics<parallel>], iteration_bounds = array<i64: 1>, scalar_prefetch = 0 : i64, scratch_operands = 1 : i64, tpu.core_type = #tpu.core_type<tc>, window_params = [{transform_indices = @transform_0, window_bounds = array<i64: 2, 1024>}, {pipeline_mode = #tpu.pipeline_mode<synchronous>, transform_indices = @transform_1, window_bounds = array<i64: 1024, 32>}, {pipeline_mode = #tpu.pipeline_mode<synchronous>, transform_indices = @transform_2, window_bounds = array<i64: 1, 32>}, {pipeline_mode = #tpu.pipeline_mode<synchronous>, transform_indices = @transform_3, window_bounds = array<i64: 32, 32>}, {pipeline_mode = #tpu.pipeline_mode<synchronous>, transform_indices = @transform_4, window_bounds = array<i64: 1, 32>}, {transform_indices = @transform_5, window_bounds = array<i64: 2, 32, 1024>}, {transform_indices = @transform_6, window_bounds = array<i64: 2, 32>}, {transform_indices = @transform_7, window_bounds = array<i64: 2, 32, 32>}, {transform_indices = @transform_8, window_bounds = array<i64: 2, 32>}, {transform_indices = @transform_9, window_bounds = array<i64: 2, 32>}]} {
    %c0 = arith.constant 0 : index
    %c0_0 = arith.constant 0 : index
    %0 = vector.load %arg1[%c0, %c0_0] : memref<2x1024xf32, #tpu.memory_space<vmem>>, vector<2x1024xf32>
    %c0_1 = arith.constant 0 : index
    %c0_2 = arith.constant 0 : index
    %1 = vector.load %arg2[%c0_1, %c0_2] : memref<1024x32xf32, #tpu.memory_space<vmem>>, vector<1024x32xf32>
    %cst = arith.constant dense<0.000000e+00> : vector<2x32xf32>
    %2 = tpu.matmul %0, %1, %cst {dimension_numbers = #tpu.dot_dimension_numbers<[1], [0], [0], [1], [0, 0, 1, 1], [], []>} : vector<2x1024xf32>, vector<1024x32xf32>, vector<2x32xf32> -> vector<2x32xf32>
    %c0_3 = arith.constant 0 : index
    %c0_4 = arith.constant 0 : index
    %3 = vector.load %arg11[%c0_3, %c0_4] : memref<2x32xf32, #tpu.memory_space<vmem>>, vector<2x32xf32>
    tpu.vector_store %arg11[%c0_3, %c0_4], %2 {strides = array<i32>} : memref<2x32xf32, #tpu.memory_space<vmem>>, vector<2x32xf32>,
    %c0_5 = arith.constant 0 : index
    %c0_6 = arith.constant 0 : index
    %4 = vector.load %arg3[%c0_5, %c0_6] : memref<1x32xf32, #tpu.memory_space<vmem>>, vector<1x32xf32>
    %c0_7 = arith.constant 0 : index
    %c0_8 = arith.constant 0 : index
    %5 = vector.load %arg4[%c0_7, %c0_8] : memref<32x32xf32, #tpu.memory_space<vmem>>, vector<32x32xf32>
    %c0_9 = arith.constant 0 : index
    %c0_10 = arith.constant 0 : index
    %6 = vector.load %arg5[%c0_9, %c0_10] : memref<1x32xf32, #tpu.memory_space<vmem>>, vector<1x32xf32>
    %c0_i32 = arith.constant 0 : i32
    %c2_i32 = arith.constant 2 : i32
    %7 = arith.addi %c0_i32, %c2_i32 : i32
    %c1_i32 = arith.constant 1 : i32
    scf.for %arg12 = %c0_i32 to %7 step %c1_i32  : i32 {
      %c1_i32_12 = arith.constant 1 : i32
      %8 = arith.muli %arg12, %c1_i32_12 : i32
      %c0_i32_13 = arith.constant 0 : i32
      %9 = arith.addi %c0_i32_13, %8 : i32
      %10 = arith.index_cast %9 : i32 to index
      %c0_14 = arith.constant 0 : index
      %11 = vector.load %arg1[%10, %c0_14] : memref<2x1024xf32, #tpu.memory_space<vmem>>, vector<1x1024xf32>
      %12 = arith.index_cast %9 : i32 to index
      %c0_15 = arith.constant 0 : index
      %c0_16 = arith.constant 0 : index
      %13 = vector.load %arg6[%12, %c0_15, %c0_16] : memref<2x32x1024xf32, #tpu.memory_space<vmem>>, vector<1x32x1024xf32>
      %14 = vector.shape_cast %13 : vector<1x32x1024xf32> to vector<32x1024xf32>
      %15 = vector.broadcast %11 : vector<1x1024xf32> to vector<32x1024xf32>
      %16 = arith.mulf %14, %15 : vector<32x1024xf32>
      %cst_17 = arith.constant dense<0.000000e+00> : vector<32xf32>
      %17 = vector.multi_reduction <add>, %16, %cst_17 [1] : vector<32x1024xf32> to vector<32xf32>
      %18 = vector.shape_cast %17 : vector<32xf32> to vector<32x1xf32>
      %19 = tpu.transpose %18, [1, 0] : vector<32x1xf32> -> vector<1x32xf32>
      %20 = arith.index_cast %9 : i32 to index
      %c0_18 = arith.constant 0 : index
      %21 = vector.load %arg11[%20, %c0_18] : memref<2x32xf32, #tpu.memory_space<vmem>>, vector<1x32xf32>
      %22 = arith.addf %21, %19 : vector<1x32xf32>
      %23 = arith.addf %22, %4 : vector<1x32xf32>
      %24 = arith.index_cast %9 : i32 to index
      %c0_19 = arith.constant 0 : index
      %25 = vector.load %arg7[%24, %c0_19] : memref<2x32xf32, #tpu.memory_space<vmem>>, vector<1x32xf32>
      %26 = arith.addf %23, %25 : vector<1x32xf32>
      %27 = math.tanh %26 : vector<1x32xf32>
      %28 = arith.index_cast %9 : i32 to index
      %c0_20 = arith.constant 0 : index
      %c0_21 = arith.constant 0 : index
      %29 = vector.load %arg8[%28, %c0_20, %c0_21] : memref<2x32x32xf32, #tpu.memory_space<vmem>>, vector<1x32x32xf32>
      %30 = vector.shape_cast %29 : vector<1x32x32xf32> to vector<32x32xf32>
      %31 = arith.addf %5, %30 : vector<32x32xf32>
      %cst_22 = arith.constant dense<0.000000e+00> : vector<1x32xf32>
      %32 = tpu.matmul %27, %31, %cst_22 {dimension_numbers = #tpu.dot_dimension_numbers<[1], [0], [0], [1], [0, 0, 1, 1], [], []>} : vector<1x32xf32>, vector<32x32xf32>, vector<1x32xf32> -> vector<1x32xf32>
      %33 = arith.addf %32, %6 : vector<1x32xf32>
      %34 = arith.index_cast %9 : i32 to index
      %c0_23 = arith.constant 0 : index
      %35 = vector.load %arg9[%34, %c0_23] : memref<2x32xf32, #tpu.memory_space<vmem>>, vector<1x32xf32>
      %36 = arith.addf %33, %35 : vector<1x32xf32>
      %37 = arith.mulf %36, %36 : vector<1x32xf32>
      %cst_24 = arith.constant dense<0.000000e+00> : vector<1xf32>
      %38 = vector.multi_reduction <add>, %37, %cst_24 [1] : vector<1x32xf32> to vector<1xf32>
      %39 = vector.shape_cast %38 : vector<1xf32> to vector<1x1xf32>
      %40 = tpu.reciprocal %39 {approx = true} : vector<1x1xf32> -> vector<1x1xf32>
      %41 = arith.mulf %39, %40 : vector<1x1xf32>
      %cst_25 = arith.constant 2.000000e+00 : f32
      %42 = vector.broadcast %cst_25 : f32 to vector<1x1xf32>
      %43 = arith.subf %42, %41 : vector<1x1xf32>
      %44 = arith.mulf %40, %43 : vector<1x1xf32>
      %45 = vector.broadcast %44 : vector<1x1xf32> to vector<1x32xf32>
      %46 = arith.mulf %36, %45 : vector<1x32xf32>
      %47 = arith.index_cast %9 : i32 to index
      %c0_26 = arith.constant 0 : index
      %48 = vector.load %arg10[%47, %c0_26] : memref<2x32xf32, #tpu.memory_space<vmem>>, vector<1x32xf32>
      tpu.vector_store %arg10[%47, %c0_26], %46 {strides = array<i32>} : memref<2x32xf32, #tpu.memory_space<vmem>>, vector<1x32xf32>,
    }
    %c2_i32_11 = arith.constant 2 : i32
    return
  }
  func.func @transform_0(%arg0: i32) -> (i32, i32) {
    %c0_i32 = arith.constant 0 : i32
    %c0_i32_0 = arith.constant 0 : i32
    return %arg0, %c0_i32 : i32, i32
  }
  func.func @transform_1(%arg0: i32) -> (i32, i32) {
    %c0_i32 = arith.constant 0 : i32
    %c0_i32_0 = arith.constant 0 : i32
    %c0_i32_1 = arith.constant 0 : i32
    return %c0_i32, %c0_i32_0 : i32, i32
  }
  func.func @transform_2(%arg0: i32) -> (i32, i32) {
    %c0_i32 = arith.constant 0 : i32
    %c0_i32_0 = arith.constant 0 : i32
    %c0_i32_1 = arith.constant 0 : i32
    return %c0_i32, %c0_i32_0 : i32, i32
  }
  func.func @transform_3(%arg0: i32) -> (i32, i32) {
    %c0_i32 = arith.constant 0 : i32
    %c0_i32_0 = arith.constant 0 : i32
    %c0_i32_1 = arith.constant 0 : i32
    return %c0_i32, %c0_i32_0 : i32, i32
  }
  func.func @transform_4(%arg0: i32) -> (i32, i32) {
    %c0_i32 = arith.constant 0 : i32
    %c0_i32_0 = arith.constant 0 : i32
    %c0_i32_1 = arith.constant 0 : i32
    return %c0_i32, %c0_i32_0 : i32, i32
  }
  func.func @transform_5(%arg0: i32) -> (i32, i32, i32) {
    %c0_i32 = arith.constant 0 : i32
    %c0_i32_0 = arith.constant 0 : i32
    %c0_i32_1 = arith.constant 0 : i32
    return %arg0, %c0_i32, %c0_i32_0 : i32, i32, i32
  }
  func.func @transform_6(%arg0: i32) -> (i32, i32) {
    %c0_i32 = arith.constant 0 : i32
    %c0_i32_0 = arith.constant 0 : i32
    return %arg0, %c0_i32 : i32, i32
  }
  func.func @transform_7(%arg0: i32) -> (i32, i32, i32) {
    %c0_i32 = arith.constant 0 : i32
    %c0_i32_0 = arith.constant 0 : i32
    %c0_i32_1 = arith.constant 0 : i32
    return %arg0, %c0_i32, %c0_i32_0 : i32, i32, i32
  }
  func.func @transform_8(%arg0: i32) -> (i32, i32) {
    %c0_i32 = arith.constant 0 : i32
    %c0_i32_0 = arith.constant 0 : i32
    return %arg0, %c0_i32 : i32, i32
  }
  func.func @transform_9(%arg0: i32) -> (i32, i32) {
    %c0_i32 = arith.constant 0 : i32
    %c0_i32_0 = arith.constant 0 : i32
    return %arg0, %c0_i32 : i32, i32
  }
}

</mosaic_0001>

<bundles_post_ra>
// kernel: forward_no_target.1
= control target key start
LH: loop header
LB: loop body
LE: loop exit
PB: predicated region body
PF: predicated region fallthrough
CT: control target
= control target key end

     0   :  { %14 = vsyncpa [#allocation4], 0  ;;  %vm344_vm0 = vcmask 254976   ;;  %s1237_s0 = inlined_call_operand.vmem [shape: f32[2,1024], index: 0, kind: input, shape index: {}]   ;;  %s1238_s1 = inlined_call_operand.vmem [shape: f32[1024,32], index: 1, kind: input, shape index: {}]   ;;  %s1239_s2 = inlined_call_operand.vmem [shape: f32[1,32], index: 2, kind: input, shape index: {}]   ;;  %s1240_s3 = inlined_call_operand.vmem [shape: f32[32,32], index: 3, kind: input, shape index: {}]   ;;  %s1241_s4 = inlined_call_operand.vmem [shape: f32[1,32], index: 4, kind: input, shape index: {}]   ;;  %s1242_s5 = inlined_call_operand.vmem [shape: f32[2,32,1024], index: 5, kind: input, shape index: {}]   ;;  %s1243_s6 = inlined_call_operand.vmem [shape: f32[2,32], index: 6, kind: input, shape index: {}]   ;;  %s1244_s7 = inlined_call_operand.vmem [shape: f32[2,32,32], index: 7, kind: input, shape index: {}]   ;;  %s1245_s8 = inlined_call_operand.vmem [shape: f32[2,32], index: 8, kind: input, shape index: {}]   ;;  %s1246_s9 = inlined_call_operand.hbm [shape: f32[2,32], index: 9, kind: output, shape index: {}]  }
   0x1   :  { %v50_v0 = vld [vmem:[%s1238_s1 + $0x78] sm:$0xff]  ;;  %v49_v2 = vld [vmem:[%s1238_s1 + $0x70] sm:$0xff]  ;;  %v48_v6 = vld [vmem:[%s1238_s1 + $0x68] sm:$0xff] }
   0x2   :  { %v82_v1 = vld [vmem:[%s1238_s1 + $0x178] sm:$0xff]  ;;  %184 = vmatpush.msra.mxu0 %v50_v0  ;;  %v81_v4 = vld [vmem:[%s1238_s1 + $0x170] sm:$0xff]  ;;  %v80_v8 = vld [vmem:[%s1238_s1 + $0x168] sm:$0xff] }
   0x3   :  { %224 = vmatpush.msra.mxu2 %v82_v1  ;;  %v66_v3 = vld [vmem:[%s1238_s1 + $0xf8] sm:$0xff]  ;;  %v65_v7 = vld [vmem:[%s1238_s1 + $0xf0] sm:$0xff]  ;;  %v47_v10 = vld [vmem:[%s1238_s1 + $0x60] sm:$0xff] }
   0x4   :  { %204 = vmatpush.msra.mxu1 %v66_v3  ;;  %v98_v5 = vld [vmem:[%s1238_s1 + $0x1f8] sm:$0xff]  ;;  %185 = vmatpush.msra.mxu0 %v49_v2  ;;  %v97_v9 = vld [vmem:[%s1238_s1 + $0x1f0] sm:$0xff]  ;;  %v64_v11 = vld [vmem:[%s1238_s1 + $0xe8] sm:$0xff] }
   0x5   :  { %225 = vmatpush.msra.mxu2 %v81_v4  ;;  %244 = vmatpush.msra.mxu3 %v98_v5  ;;  %v79_v12 = vld [vmem:[%s1238_s1 + $0x160] sm:$0xff]  ;;  %v96_v13 = vld [vmem:[%s1238_s1 + $0x1e8] sm:$0xff]  ;;  %v46_v15 = vld [vmem:[%s1238_s1 + $0x58] sm:$0xff] }
   0x6   :  { %205 = vmatpush.msra.mxu1 %v65_v7  ;;  %186 = vmatpush.msra.mxu0 %v48_v6  ;;  %v63_v14 = vld [vmem:[%s1238_s1 + $0xe0] sm:$0xff]  ;;  %v78_v16 = vld [vmem:[%s1238_s1 + $0x158] sm:$0xff]  ;;  %v45_v19 = vld [vmem:[%s1238_s1 + $0x50] sm:$0xff] }
   0x7   :  { %226 = vmatpush.msra.mxu2 %v80_v8  ;;  %245 = vmatpush.msra.mxu3 %v97_v9  ;;  %v95_v17 = vld [vmem:[%s1238_s1 + $0x1e0] sm:$0xff]  ;;  %v62_v18 = vld [vmem:[%s1238_s1 + $0xd8] sm:$0xff]  ;;  %v77_v20 = vld [vmem:[%s1238_s1 + $0x150] sm:$0xff] }
   0x8   :  { %206 = vmatpush.msra.mxu1 %v64_v11  ;;  %187 = vmatpush.msra.mxu0 %v47_v10  ;;  %v94_v21 = vld [vmem:[%s1238_s1 + $0x1d8] sm:$0xff]  ;;  %v61_v22 = vld [vmem:[%s1238_s1 + $0xd0] sm:$0xff]  ;;  %v44_v23 = vld [vmem:[%s1238_s1 + $0x48] sm:$0xff] }
   0x9   :  { %227 = vmatpush.msra.mxu2 %v79_v12  ;;  %246 = vmatpush.msra.mxu3 %v96_v13  ;;  %v76_v24 = vld [vmem:[%s1238_s1 + $0x148] sm:$0xff]  ;;  %v93_v25 = vld [vmem:[%s1238_s1 + $0x1d0] sm:$0xff]  ;;  %v43_v27 = vld [vmem:[%s1238_s1 + $0x40] sm:$0xff] }
   0xa   :  { %207 = vmatpush.msra.mxu1 %v63_v14  ;;  %188 = vmatpush.msra.mxu0 %v46_v15  ;;  %v60_v26 = vld [vmem:[%s1238_s1 + $0xc8] sm:$0xff]  ;;  %v75_v28 = vld [vmem:[%s1238_s1 + $0x140] sm:$0xff]  ;;  %v42_v31 = vld [vmem:[%s1238_s1 + $0x38] sm:$0xff] }
   0xb   :  { %228 = vmatpush.msra.mxu2 %v78_v16  ;;  %247 = vmatpush.msra.mxu3 %v95_v17  ;;  %v92_v29 = vld [vmem:[%s1238_s1 + $0x1c8] sm:$0xff]  ;;  %v59_v30 = vld [vmem:[%s1238_s1 + $0xc0] sm:$0xff]  ;;  %v74_v32 = vld [vmem:[%s1238_s1 + $0x138] sm:$0xff] }
   0xc   :  { %208 = vmatpush.msra.mxu1 %v62_v18  ;;  %189 = vmatpush.msra.mxu0 %v45_v19  ;;  %v91_v33 = vld [vmem:[%s1238_s1 + $0x1c0] sm:$0xff]  ;;  %v58_v34 = vld [vmem:[%s1238_s1 + $0xb8] sm:$0xff]  ;;  %v41_v35 = vld [vmem:[%s1238_s1 + $0x30] sm:$0xff] }
   0xd   :  { %229 = vmatpush.msra.mxu2 %v77_v20  ;;  %248 = vmatpush.msra.mxu3 %v94_v21  ;;  %v73_v36 = vld [vmem:[%s1238_s1 + $0x130] sm:$0xff]  ;;  %v90_v37 = vld [vmem:[%s1238_s1 + $0x1b8] sm:$0xff]  ;;  %v40_v39 = vld [vmem:[%s1238_s1 + $0x28] sm:$0xff] }
   0xe   :  { %209 = vmatpush.msra.mxu1 %v61_v22  ;;  %190 = vmatpush.msra.mxu0 %v44_v23  ;;  %v57_v38 = vld [vmem:[%s1238_s1 + $0xb0] sm:$0xff]  ;;  %v72_v40 = vld [vmem:[%s1238_s1 + $0x128] sm:$0xff]  ;;  %v39_v43 = vld [vmem:[%s1238_s1 + $0x20] sm:$0xff] }
   0xf   :  { %230 = vmatpush.msra.mxu2 %v76_v24  ;;  %249 = vmatpush.msra.mxu3 %v93_v25  ;;  %v89_v41 = vld [vmem:[%s1238_s1 + $0x1b0] sm:$0xff]  ;;  %v56_v42 = vld [vmem:[%s1238_s1 + $0xa8] sm:$0xff]  ;;  %v71_v44 = vld [vmem:[%s1238_s1 + $0x120] sm:$0xff] }
  0x10   :  { %210 = vmatpush.msra.mxu1 %v60_v26  ;;  %191 = vmatpush.msra.mxu0 %v43_v27  ;;  %v88_v45 = vld [vmem:[%s1238_s1 + $0x1a8] sm:$0xff]  ;;  %v55_v46 = vld [vmem:[%s1238_s1 + $0xa0] sm:$0xff]  ;;  %v38_v47 = vld [vmem:[%s1238_s1 + $0x18] sm:$0xff] }
  0x11   :  { %231 = vmatpush.msra.mxu2 %v75_v28  ;;  %250 = vmatpush.msra.mxu3 %v92_v29  ;;  %v70_v48 = vld [vmem:[%s1238_s1 + $0x118] sm:$0xff]  ;;  %v87_v49 = vld [vmem:[%s1238_s1 + $0x1a0] sm:$0xff]  ;;  %v37_v51 = vld [vmem:[%s1238_s1 + $0x10] sm:$0xff] }
  0x12   :  { %211 = vmatpush.msra.mxu1 %v59_v30  ;;  %192 = vmatpush.msra.mxu0 %v42_v31  ;;  %v54_v50 = vld [vmem:[%s1238_s1 + $0x98] sm:$0xff]  ;;  %v69_v52 = vld [vmem:[%s1238_s1 + $0x110] sm:$0xff]  ;;  %v36_v55 = vld [vmem:[%s1238_s1 + $0x8] sm:$0xff] }
  0x13   :  { %232 = vmatpush.msra.mxu2 %v74_v32  ;;  %251 = vmatpush.msra.mxu3 %v91_v33  ;;  %v86_v53 = vld [vmem:[%s1238_s1 + $0x198] sm:$0xff]  ;;  %v53_v54 = vld [vmem:[%s1238_s1 + $0x90] sm:$0xff]  ;;  %v68_v56 = vld [vmem:[%s1238_s1 + $0x108] sm:$0xff] }
  0x14   :  { %212 = vmatpush.msra.mxu1 %v58_v34  ;;  %193 = vmatpush.msra.mxu0 %v41_v35  ;;  %v85_v57 = vld [vmem:[%s1238_s1 + $0x190] sm:$0xff]  ;;  %v52_v58 = vld [vmem:[%s1238_s1 + $0x88] sm:$0xff]  ;;  %v35_v59 = vld [vmem:[%s1238_s1] sm:$0xff] }
  0x15   :  { %233 = vmatpush.msra.mxu2 %v73_v36  ;;  %252 = vmatpush.msra.mxu3 %v90_v37  ;;  %v67_v60 = vld [vmem:[%s1238_s1 + $0x100] sm:$0xff]  ;;  %v84_v61 = vld [vmem:[%s1238_s1 + $0x188] sm:$0xff]  ;;  %v114_v62 = vld [vmem:[%s1238_s1 + $0x278] sm:$0xff] }
  0x16   :  { %213 = vmatpush.msra.mxu1 %v57_v38  ;;  %194 = vmatpush.msra.mxu0 %v40_v39  ;;  %v146_v63 = vld [vmem:[%s1238_s1 + $0x378] sm:$0xff]  ;;  %v51_v0 = vld [vmem:[%s1238_s1 + $0x80] sm:$0xff]  ;;  %v113_v2 = vld [vmem:[%s1238_s1 + $0x270] sm:$0xff] }
  0x17   :  { %234 = vmatpush.msra.mxu2 %v72_v40  ;;  %253 = vmatpush.msra.mxu3 %v89_v41  ;;  %v83_v1 = vld [vmem:[%s1238_s1 + $0x180] sm:$0xff]  ;;  %v130_v3 = vld [vmem:[%s1238_s1 + $0x2f8] sm:$0xff]  ;;  %v145_v4 = vld [vmem:[%s1238_s1 + $0x370] sm:$0xff] }
  0x18   :  { %214 = vmatpush.msra.mxu1 %v56_v42  ;;  %195 = vmatpush.msra.mxu0 %v39_v43  ;;  %v162_v5 = vld [vmem:[%s1238_s1 + $0x3f8] sm:$0xff]  ;;  %v112_v6 = vld [vmem:[%s1238_s1 + $0x268] sm:$0xff]  ;;  %v129_v7 = vld [vmem:[%s1238_s1 + $0x2f0] sm:$0xff] }
  0x19   :  { %235 = vmatpush.msra.mxu2 %v71_v44  ;;  %254 = vmatpush.msra.mxu3 %v88_v45  ;;  %v144_v8 = vld [vmem:[%s1238_s1 + $0x368] sm:$0xff]  ;;  %v161_v9 = vld [vmem:[%s1238_s1 + $0x3f0] sm:$0xff]  ;;  %v111_v10 = vld [vmem:[%s1238_s1 + $0x260] sm:$0xff] }
  0x1a   :  { %215 = vmatpush.msra.mxu1 %v55_v46  ;;  %196 = vmatpush.msra.mxu0 %v38_v47  ;;  %v33_v11 = vld [vmem:[%s1237_s0] sm:$0xff]  ;;  %v128_v12 = vld [vmem:[%s1238_s1 + $0x2e8] sm:$0xff]  ;;  %v110_v15 = vld [vmem:[%s1238_s1 + $0x258] sm:$0xff] }
  0x1b   :  { %236 = vmatpush.msra.mxu2 %v70_v48  ;;  %255 = vmatpush.msra.mxu3 %v87_v49  ;;  %v143_v13 = vld [vmem:[%s1238_s1 + $0x360] sm:$0xff]  ;;  %165 = vst [vmem:[#allocation1] ss:$4 sm:$0xff] %v33_v11  ;;  %v160_v14 = vld [vmem:[%s1238_s1 + $0x3e8] sm:$0xff]  ;;  %v142_v17 = vld [vmem:[%s1238_s1 + $0x358] sm:$0xff] }
  0x1c   :  { %216 = vmatpush.msra.mxu1 %v54_v50  ;;  %197 = vmatpush.msra.mxu0 %v37_v51  ;;  %v127_v16 = vld [vmem:[%s1238_s1 + $0x2e0] sm:$0xff]  ;;  %v109_v19 = vld [vmem:[%s1238_s1 + $0x250] sm:$0xff]  ;;  %v126_v20 = vld [vmem:[%s1238_s1 + $0x2d8] sm:$0xff] }
  0x1d   :  { %237 = vmatpush.msra.mxu2 %v69_v52  ;;  %256 = vmatpush.msra.mxu3 %v86_v53  ;;  %v159_v18 = vld [vmem:[%s1238_s1 + $0x3e0] sm:$0xff]  ;;  %v141_v21 = vld [vmem:[%s1238_s1 + $0x350] sm:$0xff]  ;;  %v158_v22 = vld [vmem:[%s1238_s1 + $0x3d8] sm:$0xff] }
  0x1e   :  { %217 = vmatpush.msra.mxu1 %v53_v54  ;;  %198 = vmatpush.msra.mxu0 %v36_v55  ;;  %v108_v23 = vld [vmem:[%s1238_s1 + $0x248] sm:$0xff]  ;;  %v125_v24 = vld [vmem:[%s1238_s1 + $0x2d0] sm:$0xff]  ;;  %v107_v28 = vld [vmem:[%s1238_s1 + $0x240] sm:$0xff] }
  0x1f   :  { %238 = vmatpush.msra.mxu2 %v68_v56  ;;  %257 = vmatpush.msra.mxu3 %v85_v57  ;;  %v140_v25 = vld [vmem:[%s1238_s1 + $0x348] sm:$0xff]  ;;  %v157_v27 = vld [vmem:[%s1238_s1 + $0x3d0] sm:$0xff]  ;;  %v139_v30 = vld [vmem:[%s1238_s1 + $0x340] sm:$0xff] }
  0x20   :  { %218 = vmatpush.msra.mxu1 %v52_v58  ;;  %199 = vmatpush.msra.mxu0 %v35_v59  ;;  %v34_v26 = vld [vmem:[%s1237_s0 + $0x8] sm:$0xff]  ;;  %v106_v32 = vld [vmem:[%s1238_s1 + $0x238] sm:$0xff]  ;;  %v123_v33 = vld [vmem:[%s1238_s1 + $0x2c0] sm:$0xff] }
  0x21   :  { %239 = vmatpush.msra.mxu2 %v67_v60  ;;  %258 = vmatpush.msra.mxu3 %v84_v61  ;;  %v124_v29 = vld [vmem:[%s1238_s1 + $0x2c8] sm:$0xff]  ;;  %167 = vst [vmem:[#allocation1 + $0x20] ss:$4 sm:$0xff] %v34_v26  ;;  %v138_v34 = vld [vmem:[%s1238_s1 + $0x338] sm:$0xff]  ;;  %v155_v35 = vld [vmem:[%s1238_s1 + $0x3c0] sm:$0xff] }
  0x22   :  { %264 = vmatpush.msrb.mxu0 %v114_v62  ;;  %219 = vmatpush.msra.mxu1 %v51_v0  ;;  %v156_v31 = vld [vmem:[%s1238_s1 + $0x3c8] sm:$0xff]  ;;  %v105_v36 = vld [vmem:[%s1238_s1 + $0x230] sm:$0xff]  ;;  %v122_v37 = vld [vmem:[%s1238_s1 + $0x2b8] sm:$0xff] }
  0x23   :  { %304 = vmatpush.msrb.mxu2 %v146_v63  ;;  %259 = vmatpush.msra.mxu3 %v83_v1  ;;  %v137_v38 = vld [vmem:[%s1238_s1 + $0x330] sm:$0xff]  ;;  %v154_v39 = vld [vmem:[%s1238_s1 + $0x3b8] sm:$0xff]  ;;  %v104_v40 = vld [vmem:[%s1238_s1 + $0x228] sm:$0xff] }
  0x24   :  { %265 = vmatpush.msrb.mxu0 %v113_v2  ;;  %284 = vmatpush.msrb.mxu1 %v130_v3  ;;  %v121_v41 = vld [vmem:[%s1238_s1 + $0x2b0] sm:$0xff]  ;;  %v136_v42 = vld [vmem:[%s1238_s1 + $0x328] sm:$0xff]  ;;  %v103_v45 = vld [vmem:[%s1238_s1 + $0x220] sm:$0xff] }
  0x25   :  { %305 = vmatpush.msrb.mxu2 %v145_v4  ;;  %324 = vmatpush.msrb.mxu3 %v162_v5  ;;  %v153_v43 = vld [vmem:[%s1238_s1 + $0x3b0] sm:$0xff]  ;;  %v120_v46 = vld [vmem:[%s1238_s1 + $0x2a8] sm:$0xff]  ;;  %v135_v47 = vld [vmem:[%s1238_s1 + $0x320] sm:$0xff] }
  0x26   :  { %266 = vmatpush.msrb.mxu0 %v112_v6  ;;  %285 = vmatpush.msrb.mxu1 %v129_v7  ;;  %v170_v44 = vld.sshfl [vmem:[#allocation1 + $0x10] sm:$0xff pattern:$0x73625140]  ;;  %v152_v48 = vld [vmem:[%s1238_s1 + $0x3a8] sm:$0xff]  ;;  %v102_v51 = vld [vmem:[%s1238_s1 + $0x218] sm:$0xff] }
  0x27   :  { %306 = vmatpush.msrb.mxu2 %v144_v8  ;;  %325 = vmatpush.msrb.mxu3 %v161_v9  ;;  %v168_v49 = vld.sshfl [vmem:[#allocation1] sm:$0xff pattern:$0x73625140]  ;;  %v171_v50 = vld.sshfl [vmem:[#allocation1 + $0x18] sm:$0xff pattern:$0x73625140] }
  0x28   :  { %267 = vmatpush.msrb.mxu0 %v111_v10  ;;  %286 = vmatpush.msrb.mxu1 %v128_v12  ;;  %v119_v52 = vld [vmem:[%s1238_s1 + $0x2a0] sm:$0xff]  ;;  %v134_v53 = vld [vmem:[%s1238_s1 + $0x318] sm:$0xff]  ;;  %v169_v55 = vld.sshfl [vmem:[#allocation1 + $0x8] sm:$0xff pattern:$0x73625140] }
  0x29   :  { %307 = vmatpush.msrb.mxu2 %v143_v13  ;;  %326 = vmatpush.msrb.mxu3 %v160_v14  ;;  %v151_v54 = vld [vmem:[%s1238_s1 + $0x3a0] sm:$0xff]  ;;  %v101_v56 = vld [vmem:[%s1238_s1 + $0x210] sm:$0xff]  ;;  %v118_v57 = vld [vmem:[%s1238_s1 + $0x298] sm:$0xff] }
  0x2a   :  { %268 = vmatpush.msrb.mxu0 %v110_v15  ;;  %287 = vmatpush.msrb.mxu1 %v127_v16  ;;  %v133_v58 = vld [vmem:[%s1238_s1 + $0x310] sm:$0xff]  ;;  %v150_v59 = vld [vmem:[%s1238_s1 + $0x398] sm:$0xff]  ;;  %v100_v60 = vld [vmem:[%s1238_s1 + $0x208] sm:$0xff] }
  0x2b   :  { %308 = vmatpush.msrb.mxu2 %v142_v17  ;;  %327 = vmatpush.msrb.mxu3 %v159_v18  ;;  %v117_v61 = vld [vmem:[%s1238_s1 + $0x290] sm:$0xff]  ;;  %v132_v62 = vld [vmem:[%s1238_s1 + $0x308] sm:$0xff]  ;;  %v99_v0 = vld [vmem:[%s1238_s1 + $0x200] sm:$0xff] }
  0x2c   :  { %269 = vmatpush.msrb.mxu0 %v109_v19  ;;  %288 = vmatpush.msrb.mxu1 %v126_v20  ;;  %v149_v63 = vld [vmem:[%s1238_s1 + $0x390] sm:$0xff]  ;;  %v116_v1 = vld [vmem:[%s1238_s1 + $0x288] sm:$0xff]  ;;  %v131_v2 = vld [vmem:[%s1238_s1 + $0x300] sm:$0xff] }
  0x2d   :  { %309 = vmatpush.msrb.mxu2 %v141_v21  ;;  %328 = vmatpush.msrb.mxu3 %v158_v22  ;;  %v148_v3 = vld [vmem:[%s1238_s1 + $0x388] sm:$0xff]  ;;  %v172_v4 = vld.sshfl [vmem:[#allocation1 + $0x20] sm:$0xff pattern:$0x73625140]  ;;  %v1121_v13 = vld [vmem:[%s1240_s3 + $0x10] sm:$0xff] }
  0x2e   :  { %270 = vmatpush.msrb.mxu0 %v108_v23  ;;  %289 = vmatpush.msrb.mxu1 %v125_v24  ;;  %v174_v5 = vld.sshfl [vmem:[#allocation1 + $0x30] sm:$0xff pattern:$0x73625140]  ;;  %v115_v6 = vld [vmem:[%s1238_s1 + $0x280] sm:$0xff]  ;;  %v1116_v12 = vld [vmem:[%s1240_s3 + $0x8] sm:$0xff] }
  0x2f   :  { %310 = vmatpush.msrb.mxu2 %v140_v25  ;;  %329 = vmatpush.msrb.mxu3 %v157_v27  ;;  %v147_v7 = vld [vmem:[%s1238_s1 + $0x380] sm:$0xff]  ;;  %v173_v8 = vld.sshfl [vmem:[#allocation1 + $0x28] sm:$0xff pattern:$0x73625140]  ;;  %v1126_v14 = vld [vmem:[%s1240_s3 + $0x18] sm:$0xff] }
  0x30   :  { %271 = vmatpush.msrb.mxu0 %v107_v28  ;;  %290 = vmatpush.msrb.mxu1 %v124_v29  ;;  %v175_v9 = vld.sshfl [vmem:[#allocation1 + $0x38] sm:$0xff pattern:$0x73625140]  ;;  %v1106_v10 = vld [vmem:[%s1239_s2] sm:$0x1] }
  0x31   :  { %311 = vmatpush.msrb.mxu2 %v139_v30  ;;  %330 = vmatpush.msrb.mxu3 %v156_v31  ;;  %v1111_v11 = vld [vmem:[%s1240_s3] sm:$0xff]  ;;  %s1133_s3 = smov 0  }
  0x32   :  { %272 = vmatpush.msrb.mxu0 %v106_v32  ;;  %291 = vmatpush.msrb.mxu1 %v123_v33  ;;  %v1131_v15 = vld [vmem:[%s1241_s4] sm:$0x1] }
  0x33   :  { %312 = vmatpush.msrb.mxu2 %v138_v34  ;;  %331 = vmatpush.msrb.mxu3 %v155_v35 }
  0x34   :  { %273 = vmatpush.msrb.mxu0 %v105_v36  ;;  %292 = vmatpush.msrb.mxu1 %v122_v37 }
  0x35   :  { %313 = vmatpush.msrb.mxu2 %v137_v38  ;;  %332 = vmatpush.msrb.mxu3 %v154_v39 }
  0x36   :  { %274 = vmatpush.msrb.mxu0 %v104_v40  ;;  %293 = vmatpush.msrb.mxu1 %v121_v41 }
  0x37   :  { %314 = vmatpush.msrb.mxu2 %v136_v42  ;;  %333 = vmatpush.msrb.mxu3 %v153_v43 }
  0x38   :  { %240 = vmatmul.f32.vlgmr.msra.gmra.mxu2 %v170_v44  ;;  %275 = vmatpush.msrb.mxu0 %v103_v45 }
  0x39   :  { %294 = vmatpush.msrb.mxu1 %v120_v46  ;;  %315 = vmatpush.msrb.mxu2 %v135_v47 }
  0x3a   :  { %334 = vmatpush.msrb.mxu3 %v152_v48  ;;  %200 = vmatmul.f32.vlgmr.msra.gmra.mxu0 %v168_v49 }
  0x3b   :  { %260 = vmatmul.f32.vlgmr.msra.gmra.mxu3 %v171_v50  ;;  %276 = vmatpush.msrb.mxu0 %v102_v51 }
  0x3c   :  { %295 = vmatpush.msrb.mxu1 %v119_v52  ;;  %316 = vmatpush.msrb.mxu2 %v134_v53 }
  0x3d   :  { %335 = vmatpush.msrb.mxu3 %v151_v54  ;;  %220 = vmatmul.f32.vlgmr.msra.gmra.mxu1 %v169_v55 }
  0x3e   :  { %277 = vmatpush.msrb.mxu0 %v101_v56  ;;  %296 = vmatpush.msrb.mxu1 %v118_v57 }
  0x3f   :  { %317 = vmatpush.msrb.mxu2 %v133_v58  ;;  %336 = vmatpush.msrb.mxu3 %v150_v59 }
  0x40   :  { %278 = vmatpush.msrb.mxu0 %v100_v60  ;;  %297 = vmatpush.msrb.mxu1 %v117_v61 }
  0x41   :  { %318 = vmatpush.msrb.mxu2 %v132_v62  ;;  %337 = vmatpush.msrb.mxu3 %v149_v63 }
  0x42   :  { %279 = vmatpush.msrb.mxu0 %v99_v0  ;;  %298 = vmatpush.msrb.mxu1 %v116_v1 }
  0x43   :  { %319 = vmatpush.msrb.mxu2 %v131_v2  ;;  %338 = vmatpush.msrb.mxu3 %v148_v3 }
  0x44   :  { %280 = vmatmul.f32.vlgmr.msrb.gmra.mxu0 %v172_v4  ;;  %320 = vmatmul.f32.vlgmr.msrb.gmra.mxu2 %v174_v5 }
  0x45   :  { %299 = vmatpush.msrb.mxu1 %v115_v6  ;;  %339 = vmatpush.msrb.mxu3 %v147_v7 }
  0x46   :  { %300 = vmatmul.f32.vlgmr.msrb.gmra.mxu1 %v173_v8  ;;  %340 = vmatmul.f32.vlgmr.msrb.gmra.mxu3 %v175_v9 }
  0xb7   :  { %v201_v16 = vpop.f32.mrf.mxu0 }
  0xba   :  { %v221_v17 = vpop.f32.mrf.mxu1 }
  0xbb   :  { %v241_v18 = vpop.f32.mrf.mxu2  ;;  %v222_v19 = vadd.f32 %v221_v17, %v201_v16 }
  0xbd   :  { %v242_v20 = vadd.f32 %v241_v18, %v222_v19 }
  0xbe   :  { %v261_v21 = vpop.f32.mrf.mxu3 }
  0xbf   :  { %v262_v22 = vadd.f32 %v261_v21, %v242_v20 }
  0xc1   :  { %v281_v23 = vpop.f32.mrf.mxu0 }
  0xc2   :  { %v282_v24 = vadd.f32 %v281_v23, %v262_v22 }
  0xc3   :  { %v301_v25 = vpop.f32.mrf.mxu1 }
  0xc4   :  { %v302_v26 = vadd.f32 %v301_v25, %v282_v24 }
  0xc7   :  { %v321_v27 = vpop.f32.mrf.mxu2 }
  0xc8   :  { %v322_v28 = vadd.f32 %v321_v27, %v302_v26 }
  0xc9   :  { %v341_v29 = vpop.f32.mrf.mxu3 }
  0xca   :  { %v342_v30 = vadd.f32 %v341_v29, %v322_v28 }
  0xcc   :  { %345 = vst.msk [vmem:[#allocation2] sm:$0x3] %vm344_vm0, %v342_v30 }
  0xcd LB: > { %s358_s4 = sshra.s32 %s660_s3, 1  ;;  %s361_s27 = sand.u32 1, %s660_s3  ;;  %vm536_vm1 = vcmask 261120   ;;  %vm564_vm2 = vcmask 253952   ;;  %s660_s3 = sphi %s1133_s3, %s357_s3  }
  0xce   : > { %s612_s28 = sshll.u32 %s358_s4, 4  ;;  %s613_s29 = sshll.u32 %s660_s3, 8 }
  0xcf   : > { %s364_s30 = sadd.s32 %s612_s28, %s361_s27  ;;  %s1144_s12 = scalar_lea.vmem %s1242_s5, %s613_s29 }
  0xd0   : > { %s365_s15 = scalar_lea.vmem %s1237_s0, %s364_s30  ;;  %v370_v31 = vld [vmem:[%s1144_s12] sm:$0xff]  ;;  %v371_v33 = vld [vmem:[%s1144_s12 + $0x8] sm:$0xff]  ;;  %v372_v34 = vld [vmem:[%s1144_s12 + $0x10] sm:$0xff]  ;;  %s609_s16 = sshll.u32 %s660_s3, 5 }
  0xd1   : > { %v366_v32 = vld [vmem:[%s365_s15] ss:$2 sm:$0xff]  ;;  %v373_v38 = vld [vmem:[%s1144_s12 + $0x18] sm:$0xff]  ;;  %v380_v46 = vld [vmem:[%s1144_s12 + $0x50] sm:$0xff]  ;;  %s527_s19 = scalar_lea.vmem %s1244_s7, %s609_s16  ;;  %s519_s20 = scalar_lea.vmem [#allocation2], %s660_s3 }
  0xd2   : > { %v403_v35 = vperm.slane %v366_v32, 0  ;;  %v404_v36 = vperm.slane %v366_v32, 1  ;;  %v405_v37 = vperm.slane %v366_v32, 2  ;;  %v1153_v39 = vperm.slane %v366_v32, 3  ;;  %v378_v40 = vld [vmem:[%s1144_s12 + $0x40] sm:$0xff]  ;;  %v379_v41 = vld [vmem:[%s1144_s12 + $0x48] sm:$0xff]  ;;  %s523_s22 = scalar_lea.vmem %s1243_s6, %s660_s3  ;;  %s560_s25 = scalar_lea.vmem %s1245_s8, %s660_s3 }
  0xd3   : > { %v1157_v42 = vperm.slane %v366_v32, 4  ;;  %v374_v47 = vld [vmem:[%s1144_s12 + $0x20] sm:$0xff]  ;;  %v1161_v48 = vperm.slane %v366_v32, 5  ;;  %v381_v49 = vld [vmem:[%s1144_s12 + $0x58] sm:$0xff]  ;;  %v387_v55 = vld [vmem:[%s1144_s12 + $0x88] sm:$0xff]  ;;  %v1169_v58 = vperm.slane %v366_v32, 6 }
  0xd4   : > { %v419_v43 = vmul.f32 %v403_v35, %v370_v31  ;;  %v420_v44 = vmul.f32 %v404_v36, %v371_v33  ;;  %v421_v45 = vmul.f32 %v405_v37, %v372_v34  ;;  %v422_v50 = vmul.f32 %v1153_v39, %v373_v38  ;;  %v386_v54 = vld [vmem:[%s1144_s12 + $0x80] sm:$0xff]  ;;  %v388_v56 = vld [vmem:[%s1144_s12 + $0x90] sm:$0xff]  ;;  %v375_v57 = vld [vmem:[%s1144_s12 + $0x28] sm:$0xff]  ;;  %s573_s2 = scalar_lea.vmem [#allocation3], %s660_s3  ;;  %s357_s3 = sadd.s32 1, %s660_s3  }
  0xd5   : > { %v427_v52 = vmul.f32 %v403_v35, %v378_v40  ;;  %v428_v53 = vmul.f32 %v404_v36, %v379_v41  ;;  %v382_v59 = vld [vmem:[%s1144_s12 + $0x60] sm:$0xff]  ;;  %v429_v60 = vmul.f32 %v405_v37, %v380_v46  ;;  %v376_v61 = vld [vmem:[%s1144_s12 + $0x30] sm:$0xff]  ;;  %v423_v62 = vmul.f32 %v1157_v42, %v374_v47  ;;  %v389_v2 = vld [vmem:[%s1144_s12 + $0x98] sm:$0xff]  ;;  %p354_p0 = scmp.ge.s32.totalorder %s357_s3, 2  }
  0xd6   : > { %v451_v51 = vadd.f32 %v420_v44, %v419_v43  ;;  %v430_v0 = vmul.f32 %v1153_v39, %v381_v49  ;;  %v394_v3 = vld [vmem:[%s1144_s12 + $0xc0] sm:$0xff]  ;;  %v1177_v4 = vperm.slane %v366_v32, 7  ;;  %v383_v5 = vld [vmem:[%s1144_s12 + $0x68] sm:$0xff]  ;;  %v435_v6 = vmul.f32 %v403_v35, %v386_v54  ;;  %v396_v21 = vld [vmem:[%s1144_s12 + $0xd0] sm:$0xff]  ;;  %s582_s27 = sshll.u32 (%p354_p0), %s1246_s9, 4  ;;  %s662_s28 = smov (%p354_p0), [#allocation3]   ;;  %s583_s27 = int_to_ptr.hbm [resolvable:$true] %s582_s27 }
  0xd7   : > { %v460_v1 = vadd.f32 %v428_v53, %v427_v52  ;;  %v436_v7 = vmul.f32 %v404_v36, %v387_v55  ;;  %v437_v8 = vmul.f32 %v405_v37, %v388_v56  ;;  %v395_v9 = vld [vmem:[%s1144_s12 + $0xc8] sm:$0xff]  ;;  %v424_v16 = vmul.f32 %v1161_v48, %v375_v57  ;;  %v390_v20 = vld [vmem:[%s1144_s12 + $0xa0] sm:$0xff]  ;;  %v377_v22 = vld [vmem:[%s1144_s12 + $0x38] sm:$0xff]  ;;  %s580_s29 = sshll.u32 (%p354_p0), %s662_s28, 4  ;;  %s581_s29 = int_to_ptr.vmem [resolvable:$true] %s580_s29 }
  0xd8   : > { %v452_v63 = vadd.f32 %v451_v51, %v421_v45  ;;  %v431_v18 = vmul.f32 %v1157_v42, %v382_v59  ;;  %v425_v23 = vmul.f32 %v1169_v58, %v376_v61  ;;  %v438_v24 = vmul.f32 %v1153_v39, %v389_v2  ;;  %v391_v30 = vld [vmem:[%s1144_s12 + $0xa8] sm:$0xff]  ;;  %v397_v31 = vld [vmem:[%s1144_s12 + $0xd8] sm:$0xff]  ;;  %v384_v33 = vld [vmem:[%s1144_s12 + $0x70] sm:$0xff] }
  0xd9   : > { %v461_v19 = vadd.f32 %v460_v1, %v429_v60  ;;  %v469_v25 = vadd.f32 %v436_v7, %v435_v6  ;;  %v443_v26 = vmul.f32 %v403_v35, %v394_v3  ;;  %v432_v28 = vmul.f32 %v1161_v48, %v383_v5  ;;  %v392_v35 = vld [vmem:[%s1144_s12 + $0xb0] sm:$0xff]  ;;  %v398_v45 = vld [vmem:[%s1144_s12 + $0xe0] sm:$0xff]  ;;  %v393_v53 = vld [vmem:[%s1144_s12 + $0xb8] sm:$0xff] }
  0xda   : > { %v453_v17 = vadd.f32 %v452_v63, %v422_v50  ;;  %v444_v32 = vmul.f32 %v404_v36, %v395_v9  ;;  %v439_v34 = vmul.f32 %v1157_v42, %v390_v20  ;;  %v445_v40 = vmul.f32 %v405_v37, %v396_v21  ;;  %v399_v54 = vld [vmem:[%s1144_s12 + $0xe8] sm:$0xff]  ;;  %v385_v37 = vld [vmem:[%s1144_s12 + $0x78] sm:$0xff]  ;;  %v400_v61 = vld [vmem:[%s1144_s12 + $0xf0] sm:$0xff] }
  0xdb   : > { %v462_v29 = vadd.f32 %v461_v19, %v430_v0  ;;  %v470_v38 = vadd.f32 %v469_v25, %v437_v8  ;;  %v426_v41 = vmul.f32 %v1177_v4, %v377_v22  ;;  %v440_v46 = vmul.f32 %v1161_v48, %v391_v30  ;;  %v401_v7 = vld [vmem:[%s1144_s12 + $0xf8] sm:$0xff]  ;;  %v530_v22 = vld [vmem:[%s527_s19 + $0x10] sm:$0xff]  ;;  %v528_v25 = vld [vmem:[%s527_s19] sm:$0xff] }
  0xdc   : > { %v454_v27 = vadd.f32 %v453_v17, %v423_v62  ;;  %v446_v36 = vmul.f32 %v1153_v39, %v397_v31  ;;  %v478_v49 = vadd.f32 %v444_v32, %v443_v26  ;;  %v433_v51 = vmul.f32 %v1169_v58, %v384_v33  ;;  %v524_v31 = vld [vmem:[%s523_s22] sm:$0x1] }
  0xdd   : > { %v463_v44 = vadd.f32 %v462_v29, %v431_v18  ;;  %v471_v47 = vadd.f32 %v470_v38, %v438_v24  ;;  %v441_v55 = vmul.f32 %v1169_v58, %v392_v35  ;;  %v447_v57 = vmul.f32 %v1157_v42, %v398_v45  ;;  %v529_v24 = vld [vmem:[%s527_s19 + $0x8] sm:$0xff] }
  0xde   : > { %v455_v43 = vadd.f32 %v454_v27, %v424_v16  ;;  %v479_v59 = vadd.f32 %v478_v49, %v445_v40  ;;  %v442_v62 = vmul.f32 %v1177_v4, %v393_v53  ;;  %v448_v63 = vmul.f32 %v1161_v48, %v399_v54  ;;  %v561_v40 = vld [vmem:[%s560_s25] sm:$0x1] }
  0xdf   : > { %v464_v52 = vadd.f32 %v463_v44, %v432_v28  ;;  %v472_v56 = vadd.f32 %v471_v47, %v439_v34  ;;  %v434_v1 = vmul.f32 %v1177_v4, %v385_v37  ;;  %v449_v5 = vmul.f32 %v1169_v58, %v400_v61  ;;  %v520_v28 = vld [vmem:[%s519_s20] sm:$0x1] }
  0xe0   : > { %v456_v50 = vadd.f32 %v455_v43, %v425_v23  ;;  %v480_v0 = vadd.f32 %v479_v59, %v446_v36  ;;  %v450_v16 = vmul.f32 %v1177_v4, %v401_v7  ;;  %v531_v4 = vld [vmem:[%s527_s19 + $0x18] sm:$0xff]  ;;  %v534_v23 = vadd.f32 %v530_v22, %v1121_v13 }
  0xe1   : > { %v473_v39 = vadd.f32 %v472_v56, %v440_v46  ;;  %v465_v2 = vadd.f32 %v464_v52, %v433_v51  ;;  %v535_v21 = vadd.f32 %v531_v4, %v1126_v14  ;;  %v533_v26 = vadd.f32 %v529_v24, %v1116_v12 }
  0xe2   : > { %v457_v60 = vadd.f32 %v456_v50, %v426_v41  ;;  %v481_v6 = vadd.f32 %v480_v0, %v447_v57  ;;  %v532_v27 = vadd.f32 %v528_v25, %v1111_v11 }
  0xe3   : > { %v474_v3 = vadd.f32 %v473_v39, %v441_v55  ;;  %v466_v9 = vadd.f32 %v465_v2, %v434_v1  ;;  %552 = vmatpush.msra.mxu0 %v535_v21 }
  0xe4   : > { %458 = vadd.xlane.f32.xlu0 %v457_v60  ;;  %v482_v42 = vadd.f32 %v481_v6, %v448_v63 }
  0xe5   : > { %v475_v8 = vadd.f32 %v474_v3, %v442_v62  ;;  %553 = vmatpush.msra.mxu0 %v534_v23 }
  0xe6   : > { %v483_v17 = vadd.f32 %v482_v42, %v449_v5 }
  0xe7   : > { %476 = vadd.xlane.f32.xlu1 %v475_v8  ;;  %554 = vmatpush.msra.mxu0 %v533_v26 }
  0xe8   : > { %v484_v48 = vadd.f32 %v483_v17, %v450_v16 }
  0xe9   : > { %555 = vmatpush.msra.mxu0 %v532_v27 }
  0xec   : > { %467 = vadd.xlane.f32.xlu0 %v466_v9 }
  0xef   : > { %485 = vadd.xlane.f32.xlu1 %v484_v48 }
 0x157   : > { %v459_v18 = vpop.xlane.xlu0 %458 }
 0x158   : > { %487 = vxpose.xlu2.b32.start [1/4] (short) (narrow) %v459_v18, 8 }
 0x15a   : > { %v477_v20 = vpop.xlane.xlu1 %476 }
 0x15f   : > { %v468_v19 = vpop.xlane.xlu0 %467 }
 0x160   : > { %488 = vxpose.xlu2.b32.cont [2/4] (short) (narrow) %v468_v19, 8 }
 0x162   : > { %v486_v58 = vpop.xlane.xlu1 %485 }
 0x168   : > { %489 = vxpose.xlu2.b32.cont [3/4] (short) (narrow) %v477_v20, 8 }
 0x170   : > { %490 = vxpose.xlu2.b32.end [4/4] (short) (narrow) %v486_v58, 8 }
 0x1f1   : > { %v503_v29 = vpop.trf.xlu2 }
 0x1f2   : > { %v521_v30 = vadd.f32 %v520_v28, %v503_v29 }
 0x1f4   : > { %v522_v32 = vadd.f32 %v521_v30, %v1106_v10 }
 0x1f6   : > { %v525_v33 = vadd.f32 %v524_v31, %v522_v32 }
 0x1f8   : > { %624 = vtanh.f32 %v525_v33 }
 0x1fe   : > { %v625_v34 = vpop.eup %624 }
 0x1ff   : > { %611 = vmatmul.msk.f32.vlgmr.msra.gmra.mxu0 %vm536_vm1, %v625_v34 }
 0x27c   : > { %v557_v38 = vpop.f32.mrf.mxu0 }
 0x27d   : > { %v558_v41 = vadd.f32 %v557_v38, %v1131_v15 }
 0x27f   : > { %v562_v43 = vadd.f32 %v561_v40, %v558_v41 }
 0x281   : > { %v563_v44 = vmul.f32 %v562_v43, %v562_v43 }
 0x283   : > { %v565_v35 = vsel %vm564_vm2, %v563_v44, 0.0 }
 0x284   : > { %566 = vadd.xlane.f32.xlu0 %v565_v35 }
 0x2f7   : > { %v567_v45 = vpop.xlane.xlu0 %566 }
 0x2f8   : > { %626 = vrcp.f32 %v567_v45 }
 0x2fe   : > { %v627_v46 = vpop.eup %626 }
 0x2ff   : > { %v569_v47 = vmul.f32 %v627_v46, %v567_v45 }
 0x301   : > { %v570_v36 = vsub.f32 2.0, %v569_v47 }
 0x303   : > { %v571_v49 = vmul.f32 %v627_v46, %v570_v36  ;;  %356 = sbr.rel (!%p354_p0) target bundleno = 205 (0xcd), region = 71 }
 0x305   : > { %v572_v50 = vmul.f32 %v571_v49, %v562_v43 }
 0x307   : > { %574 = vst.msk [vmem:[%s573_s2] sm:$0x1] %vm564_vm2, %v572_v50 }
 0x308   :  { %585 = dma.vmem_to_hbm [thread:$0]  %s581_s29, 32, %s583_s27, [#allocation4]  }
 0x309   :  { %656 = dma.done.wait [#allocation4], 32  }
 0x30a   :  { %657 = vsyncadd [#allocation4], 4294967264 }
 0x30b   :  { %590 = vsyncpa [#allocation4], 1 }

</bundles_post_ra>
